<compile_context>
chip_gen: v5e
topology: v5e:2x2
jax: 0.10.0
libtpu: 0.0.40
codegen_flags: <defaults>
</compile_context>

<pallas_src>
import jax
import jax.numpy as jnp
from jax.experimental import pallas as pl
from jax.experimental.pallas import tpu as pltpu


def gcn_kernel(x_ref, w1pI_ref, b1_ref, w2_ref, w3t_ref, b3_ref, o_ref):
    """One grid step: a (Bt, S, N) batch block -> (Bt, S, M) output block."""
    Bt, S, N = x_ref.shape
    M = o_ref.shape[-1]
    cd = w1pI_ref.dtype          # MXU operand dtype (bf16 by default, f32 optional)

    # conv1 + residual (residual pre-folded into W1^T + I), flattened to one
    # (Bt*S, N) x (N, N) GEMM.  S is a multiple of 8, so the reshape is a free,
    # layout-preserving merge of the leading dims.
    x2 = x_ref[...].reshape(Bt * S, N).astype(cd)
    h = jnp.dot(x2, w1pI_ref[...], preferred_element_type=jnp.float32)
    h = h + b1_ref[...]                      # (1, N) f32 broadcast
    h = jnp.maximum(h, 0.0)                  # relu in f32 (v5e VPU has no bf16)

    # conv2: per-batch (S, S) @ (S, N).  jnp.dot is not batched, so use a
    # batched einsum with W2 broadcast along the batch-block dim (MXU path).
    h_b = h.reshape(Bt, S, N).astype(cd)
    w2_b = jnp.broadcast_to(w2_ref[...], (Bt, S, S))
    h2 = jnp.einsum("bts,bsn->btn", w2_b, h_b,
                    preferred_element_type=jnp.float32)

    # conv3: flattened (Bt*S, N) x (N, M) GEMM, then bias.
    out = jnp.dot(h2.reshape(Bt * S, N).astype(cd), w3t_ref[...],
                  preferred_element_type=jnp.float32)
    out = out + b3_ref[...]                  # (1, M) f32 broadcast

    o_ref[...] = out.reshape(Bt, S, M).astype(o_ref.dtype)


def prepare_gcn_params(w1, b1, w2, w3, b3, compute_dtype=jnp.bfloat16):
    """One-time parameter prep (hoisted out of the per-call path).

    * residual fold: x @ W1^T + x == x @ (W1^T + I)  (mathematically exact)
    * pre-transpose conv1/conv3 weights so every in-kernel matmul is row-major
    * cast MXU operands to `compute_dtype` (bf16 feeds the MXU at full rate on
      v6e/v7x and halves weight DMA bytes); biases stay f32 for the VPU adds.
    """
    N = w1.shape[0]
    M = w3.shape[0]
    w1pI = (jnp.transpose(w1).astype(jnp.float32)
            + jnp.eye(N, dtype=jnp.float32)).astype(compute_dtype)
    w3t = jnp.transpose(w3).astype(compute_dtype)
    w2c = w2.astype(compute_dtype)
    b1r = b1.reshape(1, N).astype(jnp.float32)
    b3r = b3.reshape(1, M).astype(jnp.float32)
    return w1pI, b1r, w2c, w3t, b3r


def _round_up(v, m):
    return ((v + m - 1) // m) * m


def _padded_block_bytes(shape, dtype):
    """VMEM footprint of one buffered block, padded to (8, 128) tiles."""
    dims = list(shape)
    dims[-1] = _round_up(dims[-1], 128)
    if len(dims) >= 2:
        dims[-2] = _round_up(dims[-2], 8)
    n = 1
    for d in dims:
        n *= d
    return n * dtype.itemsize


def _pick_block_b(B, S, N, itemsize, max_block_bytes=4 << 20):
    """Largest batch block that divides B, leaves >=2 grid steps when B >= 2
    (keeps both v7x TensorCores busy; on v5e/v6e fewer+larger steps is fine),
    and keeps the x block small enough for comfortable double-buffering."""
    for cand in range(B, 0, -1):
        if B % cand != 0:
            continue
        if B >= 2 and B // cand < 2:
            continue
        if cand > 1 and cand * S * N * itemsize > max_block_bytes:
            continue
        return cand
    return 1


def gcn_forward(x, params, *, block_b=None):
    """x: (B, S, N) with S % 8 == 0.  params: output of prepare_gcn_params."""
    w1pI, b1r, w2c, w3t, b3r = params
    B, S, N = x.shape
    M = w3t.shape[1]

    if block_b is None:
        block_b = _pick_block_b(B, S, N, x.dtype.itemsize)
    assert B % block_b == 0, (B, block_b)
    num_blocks = B // block_b

    # Explicit VMEM budget: covers double-buffered blocks + f32 temporaries,
    # clamped so it stays inside v7x's 64 MiB physical VMEM.
    est = sum(_padded_block_bytes(s, d) for s, d in [
        ((block_b, S, N), x.dtype),
        ((block_b, S, M), x.dtype),
        (w1pI.shape, w1pI.dtype),
        (b1r.shape, b1r.dtype),
        (w2c.shape, w2c.dtype),
        (w3t.shape, w3t.dtype),
        (b3r.shape, b3r.dtype),
    ])
    vmem_limit = int(min(max(4 * est + (8 << 20), 16 << 20), 48 << 20))

    return pl.pallas_call(
        gcn_kernel,
        out_shape=jax.ShapeDtypeStruct((B, S, M), x.dtype),
        grid_spec=pltpu.PrefetchScalarGridSpec(
            num_scalar_prefetch=0,
            grid=(num_blocks,),
            in_specs=[
                pl.BlockSpec((block_b, S, N), lambda b: (b, 0, 0)),  # x block
                pl.BlockSpec((N, N), lambda b: (0, 0)),              # W1^T + I
                pl.BlockSpec((1, N), lambda b: (0, 0)),              # b1
                pl.BlockSpec((S, S), lambda b: (0, 0)),              # W2
                pl.BlockSpec((N, M), lambda b: (0, 0)),              # W3^T
                pl.BlockSpec((1, M), lambda b: (0, 0)),              # b3
            ],
            out_specs=pl.BlockSpec((block_b, S, M), lambda b: (b, 0, 0)),
        ),
        compiler_params=pltpu.CompilerParams(
            dimension_semantics=("parallel",),
            vmem_limit_bytes=vmem_limit,
        ),
    )(x, w1pI, b1r, w2c, w3t, b3r)


def gcn_reference(x, w1, b1, w2, w3, b3, compute_dtype=jnp.float32):
    """Pure-JAX reference for the PyTorch GCN forward.  `compute_dtype` mimics
    the kernel's MXU operand dtype (operands in compute_dtype, f32 accumulate);
    the residual fold x@W1^T + x == x@(W1^T + I) is mathematically exact."""
    cd = compute_dtype
    N = w1.shape[0]
    w1pI = (jnp.transpose(w1) + jnp.eye(N, dtype=w1.dtype)).astype(cd)
    h = jnp.einsum("bsn,nk->bsk", x.astype(cd), w1pI,
                   preferred_element_type=jnp.float32)
    h = h + b1.astype(jnp.float32)[None, None, :]
    h = jnp.maximum(h, 0.0)
    h2 = jnp.einsum("ts,bsn->btn", w2.astype(cd), h.astype(cd),
                    preferred_element_type=jnp.float32)
    out = jnp.einsum("bsn,nm->bsm", h2.astype(cd), jnp.transpose(w3).astype(cd),
                     preferred_element_type=jnp.float32)
    out = out + b3.astype(jnp.float32)[None, None, :]
    return out.astype(x.dtype)


if __name__ == "__main__":
    B, S, N = 4, 32, 16          # batch, num_state, num_node
    M = N // 2

    key = jax.random.PRNGKey(0)
    kx, k1, kb1, k2, k3, kb3 = jax.random.split(key, 6)

    x = jax.random.normal(kx, (B, S, N), dtype=jnp.float32)
    w1 = jax.random.normal(k1, (N, N), dtype=jnp.float32) * (1.0 / N) ** 0.5
    b1 = jax.random.normal(kb1, (N,), dtype=jnp.float32) * 0.1
    w2 = jax.random.normal(k2, (S, S), dtype=jnp.float32) * (1.0 / S) ** 0.5
    w3 = jax.random.normal(k3, (M, N), dtype=jnp.float32) * (1.0 / N) ** 0.5
    b3 = jax.random.normal(kb3, (M,), dtype=jnp.float32) * 0.1

    # 1) Exact-semantics check: f32 compute path vs. pure-f32 reference.
    params_f32 = prepare_gcn_params(w1, b1, w2, w3, b3, compute_dtype=jnp.float32)
    out_f32 = jax.block_until_ready(gcn_forward(x, params_f32))
    ref_f32 = gcn_reference(x, w1, b1, w2, w3, b3, compute_dtype=jnp.float32)
    assert out_f32.shape == (B, S, M), out_f32.shape
    assert jnp.allclose(out_f32, ref_f32, atol=1e-3, rtol=1e-3), "f32 mismatch"

    # 2) Production path: bf16 MXU operands with f32 accumulation/elementwise,
    #    checked against a reference applying the same operand casts.
    params_bf16 = prepare_gcn_params(w1, b1, w2, w3, b3, compute_dtype=jnp.bfloat16)
    out_bf16 = jax.block_until_ready(gcn_forward(x, params_bf16))
    ref_bf16 = gcn_reference(x, w1, b1, w2, w3, b3, compute_dtype=jnp.bfloat16)
    assert out_bf16.shape == (B, S, M), out_bf16.shape
    assert jnp.allclose(out_bf16, ref_bf16, atol=2e-3, rtol=2e-3), "bf16 mismatch"

    print("KERNEL_OK")
</pallas_src>

<mosaic_0001>
module attributes {stable_mosaic.version = 11 : i64} {
  func.func @gcn_kernel(%arg0: i32, %arg1: memref<2x32x16xf32, #tpu.memory_space<vmem>>, %arg2: memref<16x16xf32, #tpu.memory_space<vmem>>, %arg3: memref<1x16xf32, #tpu.memory_space<vmem>>, %arg4: memref<32x32xf32, #tpu.memory_space<vmem>>, %arg5: memref<16x8xf32, #tpu.memory_space<vmem>>, %arg6: memref<1x8xf32, #tpu.memory_space<vmem>>, %arg7: memref<2x32x8xf32, #tpu.memory_space<vmem>>) attributes {dimension_semantics = [#tpu.dimension_semantics<parallel>], iteration_bounds = array<i64: 2>, scalar_prefetch = 0 : i64, scratch_operands = 0 : i64, tpu.core_type = #tpu.core_type<tc>, window_params = [{transform_indices = @transform_0, window_bounds = array<i64: 2, 32, 16>}, {pipeline_mode = #tpu.pipeline_mode<synchronous>, transform_indices = @transform_1, window_bounds = array<i64: 16, 16>}, {pipeline_mode = #tpu.pipeline_mode<synchronous>, transform_indices = @transform_2, window_bounds = array<i64: 1, 16>}, {pipeline_mode = #tpu.pipeline_mode<synchronous>, transform_indices = @transform_3, window_bounds = array<i64: 32, 32>}, {pipeline_mode = #tpu.pipeline_mode<synchronous>, transform_indices = @transform_4, window_bounds = array<i64: 16, 8>}, {pipeline_mode = #tpu.pipeline_mode<synchronous>, transform_indices = @transform_5, window_bounds = array<i64: 1, 8>}, {transform_indices = @transform_6, window_bounds = array<i64: 2, 32, 8>}]} {
    %c0 = arith.constant 0 : index
    %c0_0 = arith.constant 0 : index
    %c0_1 = arith.constant 0 : index
    %0 = vector.load %arg1[%c0, %c0_0, %c0_1] : memref<2x32x16xf32, #tpu.memory_space<vmem>>, vector<2x32x16xf32>
    %1 = vector.shape_cast %0 : vector<2x32x16xf32> to vector<64x16xf32>
    %c0_2 = arith.constant 0 : index
    %c0_3 = arith.constant 0 : index
    %2 = vector.load %arg2[%c0_2, %c0_3] : memref<16x16xf32, #tpu.memory_space<vmem>>, vector<16x16xf32>
    %cst = arith.constant dense<0.000000e+00> : vector<64x16xf32>
    %3 = tpu.matmul %1, %2, %cst {dimension_numbers = #tpu.dot_dimension_numbers<[1], [0], [0], [1], [0, 0, 1, 1], [], []>} : vector<64x16xf32>, vector<16x16xf32>, vector<64x16xf32> -> vector<64x16xf32>
    %c0_4 = arith.constant 0 : index
    %c0_5 = arith.constant 0 : index
    %4 = vector.load %arg3[%c0_4, %c0_5] : memref<1x16xf32, #tpu.memory_space<vmem>>, vector<1x16xf32>
    %5 = vector.broadcast %4 : vector<1x16xf32> to vector<64x16xf32>
    %6 = arith.addf %3, %5 : vector<64x16xf32>
    %cst_6 = arith.constant 0.000000e+00 : f32
    %7 = vector.broadcast %cst_6 : f32 to vector<64x16xf32>
    %8 = arith.maximumf %6, %7 : vector<64x16xf32>
    %9 = vector.shape_cast %8 : vector<64x16xf32> to vector<2x32x16xf32>
    %c0_7 = arith.constant 0 : index
    %c0_8 = arith.constant 0 : index
    %10 = vector.load %arg4[%c0_7, %c0_8] : memref<32x32xf32, #tpu.memory_space<vmem>>, vector<32x32xf32>
    %11 = vector.shape_cast %10 : vector<32x32xf32> to vector<1x32x32xf32>
    %12 = vector.broadcast %11 : vector<1x32x32xf32> to vector<2x32x32xf32>
    "tpu.trace_start"() <{level = 10 : i32, message = "bts,bsn->btn"}> : () -> ()
    %cst_9 = arith.constant dense<0.000000e+00> : vector<2x32x16xf32>
    %13 = tpu.matmul %12, %9, %cst_9 {dimension_numbers = #tpu.dot_dimension_numbers<[2], [1], [1], [2], [0, 0, 0, 1, 1, 2], [0], [0]>} : vector<2x32x32xf32>, vector<2x32x16xf32>, vector<2x32x16xf32> -> vector<2x32x16xf32>
    "tpu.trace_stop"() : () -> ()
    %14 = vector.shape_cast %13 : vector<2x32x16xf32> to vector<64x16xf32>
    %c0_10 = arith.constant 0 : index
    %c0_11 = arith.constant 0 : index
    %15 = vector.load %arg5[%c0_10, %c0_11] : memref<16x8xf32, #tpu.memory_space<vmem>>, vector<16x8xf32>
    %cst_12 = arith.constant dense<0.000000e+00> : vector<64x8xf32>
    %16 = tpu.matmul %14, %15, %cst_12 {dimension_numbers = #tpu.dot_dimension_numbers<[1], [0], [0], [1], [0, 0, 1, 1], [], []>} : vector<64x16xf32>, vector<16x8xf32>, vector<64x8xf32> -> vector<64x8xf32>
    %c0_13 = arith.constant 0 : index
    %c0_14 = arith.constant 0 : index
    %17 = vector.load %arg6[%c0_13, %c0_14] : memref<1x8xf32, #tpu.memory_space<vmem>>, vector<1x8xf32>
    %18 = vector.broadcast %17 : vector<1x8xf32> to vector<64x8xf32>
    %19 = arith.addf %16, %18 : vector<64x8xf32>
    %20 = vector.shape_cast %19 : vector<64x8xf32> to vector<2x32x8xf32>
    %c0_15 = arith.constant 0 : index
    %c0_16 = arith.constant 0 : index
    %c0_17 = arith.constant 0 : index
    %21 = vector.load %arg7[%c0_15, %c0_16, %c0_17] : memref<2x32x8xf32, #tpu.memory_space<vmem>>, vector<2x32x8xf32>
    tpu.vector_store %arg7[%c0_15, %c0_16, %c0_17], %20 {strides = array<i32>} : memref<2x32x8xf32, #tpu.memory_space<vmem>>, vector<2x32x8xf32>,
    return
  }
  func.func @transform_0(%arg0: i32) -> (i32, i32, i32) {
    %c0_i32 = arith.constant 0 : i32
    %c0_i32_0 = arith.constant 0 : i32
    %c0_i32_1 = arith.constant 0 : i32
    return %arg0, %c0_i32, %c0_i32_0 : i32, i32, i32
  }
  func.func @transform_1(%arg0: i32) -> (i32, i32) {
    %c0_i32 = arith.constant 0 : i32
    %c0_i32_0 = arith.constant 0 : i32
    %c0_i32_1 = arith.constant 0 : i32
    return %c0_i32, %c0_i32_0 : i32, i32
  }
  func.func @transform_2(%arg0: i32) -> (i32, i32) {
    %c0_i32 = arith.constant 0 : i32
    %c0_i32_0 = arith.constant 0 : i32
    %c0_i32_1 = arith.constant 0 : i32
    return %c0_i32, %c0_i32_0 : i32, i32
  }
  func.func @transform_3(%arg0: i32) -> (i32, i32) {
    %c0_i32 = arith.constant 0 : i32
    %c0_i32_0 = arith.constant 0 : i32
    %c0_i32_1 = arith.constant 0 : i32
    return %c0_i32, %c0_i32_0 : i32, i32
  }
  func.func @transform_4(%arg0: i32) -> (i32, i32) {
    %c0_i32 = arith.constant 0 : i32
    %c0_i32_0 = arith.constant 0 : i32
    %c0_i32_1 = arith.constant 0 : i32
    return %c0_i32, %c0_i32_0 : i32, i32
  }
  func.func @transform_5(%arg0: i32) -> (i32, i32) {
    %c0_i32 = arith.constant 0 : i32
    %c0_i32_0 = arith.constant 0 : i32
    %c0_i32_1 = arith.constant 0 : i32
    return %c0_i32, %c0_i32_0 : i32, i32
  }
  func.func @transform_6(%arg0: i32) -> (i32, i32, i32) {
    %c0_i32 = arith.constant 0 : i32
    %c0_i32_0 = arith.constant 0 : i32
    %c0_i32_1 = arith.constant 0 : i32
    return %arg0, %c0_i32, %c0_i32_0 : i32, i32, i32
  }
}

</mosaic_0001>

<bundles_post_ra>
// kernel: tpu_custom_call.1
= control target key start
LH: loop header
LB: loop body
LE: loop exit
PB: predicated region body
PF: predicated region fallthrough
CT: control target
= control target key end

     0   :  { %s657_s21 = smov 0   ;;  %s743_s0 = inlined_call_operand.vmem [shape: f32[4,32,16], index: 0, kind: input, shape index: {}]   ;;  %s744_s1 = inlined_call_operand.vmem [shape: f32[16,16], index: 1, kind: input, shape index: {}]   ;;  %s745_s2 = inlined_call_operand.vmem [shape: f32[1,16], index: 2, kind: input, shape index: {}]   ;;  %s746_s3 = inlined_call_operand.vmem [shape: f32[32,32], index: 3, kind: input, shape index: {}]   ;;  %s747_s4 = inlined_call_operand.vmem [shape: f32[16,8], index: 4, kind: input, shape index: {}]   ;;  %s748_s5 = inlined_call_operand.vmem [shape: f32[1,8], index: 5, kind: input, shape index: {}]   ;;  %s749_s6 = inlined_call_operand.vmem [shape: f32[4,32,8], index: 6, kind: output, shape index: {}]  }
   0x1 LB: > { %s561_s22 = sadd.s32 4294967295, %s620_s21   ;;  %p565_p0 = scmp.ge.s32.totalorder %s620_s21, 1  ;;  %s620_s21 = sphi %s657_s21, %s16_s21  }
   0x2   : > { %p214_p1 = scmp.lt.s32.totalorder %s620_s21, 3 }
   0x4   : > { %p215_p2 = pnand %p565_p0, %p214_p1 }
   0x5   : > { %s566_s27 = sshll.u32 (!%p215_p2), %s561_s22, 1 }
   0x6   : > { %218 = sbr.rel (%p215_p2) target bundleno = 493 (0x1ed), region = 44  ;;  %p247_p3 = scmp.lt.s32.totalorder (!%p215_p2), %s566_s27, 3 }
   0xb   : > { %v269_v0 = vld [vmem:[%s744_s1 + $0x8] sm:$0xff]  ;;  %v268_v1 = vld [vmem:[%s744_s1] sm:$0xff]  ;;  %s751_s27 = smov (!%p247_p3, %s566_s27), 3  ;;  %vm274_vm0 = vcmask 130048   ;;  %vm352_vm1 = vcmask 261120   ;;  %v350_v33 = vld [vmem:[%s746_s3 + $0x10] sm:$0xff] }
   0xc   : > { %313 = vmatpush.msra.mxu0 %v269_v0  ;;  %600 = vmatpush.msra.mxu1 %v269_v0  ;;  %s598_s28 = sshll.u32 %s751_s27, 5  ;;  %v612_v13 = vld [vmem:[%s745_s2] ss:$0 sm:$0xff]  ;;  %v349_v29 = vld [vmem:[%s746_s3 + $0x8] sm:$0xff]  ;;  %v351_v39 = vld [vmem:[%s746_s3 + $0x18] sm:$0xff]  ;;  %vm494_vm2 = vcmask 64512  }
   0xd   : > { %s251_s7 = scalar_lea.vmem %s743_s0, %s598_s28  ;;  %v348_v27 = vld [vmem:[%s746_s3] sm:$0xff]  ;;  %v424_v34 = vld [vmem:[%s747_s4 + $0x8] sm:$0xff]  ;;  %s258_s29 = scalar_lea.vmem %s749_s6, %s598_s28 }
   0xe   : > { %314 = vmatpush.msra.mxu0 %v268_v1  ;;  %601 = vmatpush.msra.mxu1 %v268_v1  ;;  %v260_v2 = vld [vmem:[%s251_s7] sm:$0xff]  ;;  %v261_v3 = vld [vmem:[%s251_s7 + $0x8] sm:$0xff]  ;;  %v267_v4 = vld [vmem:[%s251_s7 + $0x38] sm:$0xff] }
   0xf   : > { %572 = vmatmul.msk.f32.vlgmr.msra.gmra.mxu0 %vm274_vm0, %v260_v2  ;;  %579 = vmatmul.msk.f32.vlgmr.msra.gmra.mxu1 %vm274_vm0, %v267_v4  ;;  %v262_v5 = vld [vmem:[%s251_s7 + $0x10] sm:$0xff]  ;;  %v263_v6 = vld [vmem:[%s251_s7 + $0x18] sm:$0xff]  ;;  %v264_v7 = vld [vmem:[%s251_s7 + $0x20] sm:$0xff] }
  0x10   : > { %v265_v8 = vld [vmem:[%s251_s7 + $0x28] sm:$0xff]  ;;  %v266_v9 = vld [vmem:[%s251_s7 + $0x30] sm:$0xff]  ;;  %602 = vmatpush.msra.mxu3 %v424_v34  ;;  %v423_v40 = vld [vmem:[%s747_s4] sm:$0xff] }
  0x11   : > { %v613_v49 = vld [vmem:[%s748_s5] ss:$0 sm:$0xff] }
  0x12   : > { %603 = vmatpush.msra.mxu3 %v423_v40 }
  0x17   : > { %573 = vmatmul.msk.f32.gmra.mxu0 %vm274_vm0, %v261_v3 }
  0x1f   : > { %574 = vmatmul.msk.f32.gmra.mxu0 %vm274_vm0, %v262_v5 }
  0x27   : > { %575 = vmatmul.msk.f32.gmra.mxu0 %vm274_vm0, %v263_v6 }
  0x2f   : > { %576 = vmatmul.msk.f32.gmra.mxu0 %vm274_vm0, %v264_v7 }
  0x37   : > { %577 = vmatmul.msk.f32.gmra.mxu0 %vm274_vm0, %v265_v8 }
  0x3f   : > { %578 = vmatmul.msk.f32.gmra.mxu0 %vm274_vm0, %v266_v9 }
  0x8c   : > { %v316_v10 = vpop.f32.mrf.mxu0  ;;  %v337_v12 = vpop.f32.mrf.mxu1 }
  0x8d   : > { %v338_v14 = vadd.f32 %v612_v13, %v337_v12  ;;  %v317_v22 = vadd.f32 %v612_v13, %v316_v10 }
  0x8f   : > { %v347_v16 = vmax.f32 %v338_v14, 0.0  ;;  %v340_v26 = vmax.f32 %v317_v22, 0.0 }
  0x91   : > { %406 = vmatpush.msra.mxu2 %v347_v16 }
  0x94   : > { %v319_v11 = vpop.f32.mrf.mxu0 }
  0x95   : > { %v320_v20 = vadd.f32 %v612_v13, %v319_v11 }
  0x97   : > { %v341_v24 = vmax.f32 %v320_v20, 0.0 }
  0x9c   : > { %v322_v15 = vpop.f32.mrf.mxu0 }
  0x9d   : > { %v323_v18 = vadd.f32 %v612_v13, %v322_v15 }
  0x9f   : > { %v342_v23 = vmax.f32 %v323_v18, 0.0 }
  0xa4   : > { %v325_v17 = vpop.f32.mrf.mxu0 }
  0xa5   : > { %v326_v19 = vadd.f32 %v612_v13, %v325_v17 }
  0xa7   : > { %v343_v21 = vmax.f32 %v326_v19, 0.0 }
  0xa9   : > { %377 = vmatpush.msrb.mxu1 %v343_v21 }
  0xab   : > { %378 = vmatpush.msrb.mxu1 %v342_v23 }
  0xac   : > { %v328_v25 = vpop.f32.mrf.mxu0 }
  0xad   : > { %379 = vmatpush.msrb.mxu1 %v341_v24  ;;  %v329_v35 = vadd.f32 %v612_v13, %v328_v25 }
  0xaf   : > { %380 = vmatpush.msrb.mxu1 %v340_v26  ;;  %v344_v38 = vmax.f32 %v329_v35, 0.0 }
  0xb0   : > { %580 = vmatmul.msk.f32.vlgmr.msrb.gmra.mxu1 %vm352_vm1, %v348_v27 }
  0xb4   : > { %v331_v28 = vpop.f32.mrf.mxu0 }
  0xb5   : > { %v332_v31 = vadd.f32 %v612_v13, %v331_v28 }
  0xb7   : > { %v345_v37 = vmax.f32 %v332_v31, 0.0 }
  0xb8   : > { %581 = vmatmul.msk.f32.gmra.mxu1 %vm352_vm1, %v349_v29 }
  0xbc   : > { %v334_v30 = vpop.f32.mrf.mxu0 }
  0xbd   : > { %v335_v32 = vadd.f32 %v612_v13, %v334_v30 }
  0xbf   : > { %v346_v36 = vmax.f32 %v335_v32, 0.0 }
  0xc0   : > { %582 = vmatmul.msk.f32.gmra.mxu1 %vm352_vm1, %v350_v33 }
  0xc1   : > { %407 = vmatpush.msra.mxu2 %v346_v36 }
  0xc3   : > { %408 = vmatpush.msra.mxu2 %v345_v37 }
  0xc5   : > { %409 = vmatpush.msra.mxu2 %v344_v38 }
  0xc6   : > { %584 = vmatmul.msk.f32.vlgmr.msra.gmra.mxu2 %vm352_vm1, %v348_v27 }
  0xc7   : > { %467 = vmatpush.msrb.mxu2 %v424_v34 }
  0xc8   : > { %583 = vmatmul.msk.f32.gmra.mxu1 %vm352_vm1, %v351_v39 }
  0xc9   : > { %468 = vmatpush.msrb.mxu2 %v423_v40 }
  0xce   : > { %585 = vmatmul.msk.f32.gmra.mxu2 %vm352_vm1, %v349_v29 }
  0xd6   : > { %586 = vmatmul.msk.f32.gmra.mxu2 %vm352_vm1, %v350_v33 }
  0xde   : > { %587 = vmatmul.msk.f32.gmra.mxu2 %vm352_vm1, %v351_v39 }
 0x12d   : > { %v382_v41 = vpop.f32.mrf.mxu1 }
 0x12e   : > { %588 = vmatmul.msk.f32.vlgmr.msrb.gmra.mxu2 %vm274_vm0, %v382_v41 }
 0x135   : > { %v385_v42 = vpop.f32.mrf.mxu1 }
 0x136   : > { %589 = vmatmul.msk.f32.vlgmr.msra.gmra.mxu3 %vm274_vm0, %v385_v42 }
 0x13d   : > { %v388_v43 = vpop.f32.mrf.mxu1 }
 0x13e   : > { %590 = vmatmul.msk.f32.gmra.mxu3 %vm274_vm0, %v388_v43 }
 0x145   : > { %v391_v44 = vpop.f32.mrf.mxu1 }
 0x146   : > { %591 = vmatmul.msk.f32.gmra.mxu3 %vm274_vm0, %v391_v44 }
 0x149   : > { %v411_v45 = vpop.f32.mrf.mxu2 }
 0x14e   : > { %592 = vmatmul.msk.f32.gmra.mxu3 %vm274_vm0, %v411_v45 }
 0x151   : > { %v414_v46 = vpop.f32.mrf.mxu2 }
 0x156   : > { %593 = vmatmul.msk.f32.gmra.mxu3 %vm274_vm0, %v414_v46 }
 0x159   : > { %v417_v47 = vpop.f32.mrf.mxu2 }
 0x15e   : > { %594 = vmatmul.msk.f32.gmra.mxu3 %vm274_vm0, %v417_v47 }
 0x161   : > { %v420_v48 = vpop.f32.mrf.mxu2 }
 0x166   : > { %595 = vmatmul.msk.f32.gmra.mxu3 %vm274_vm0, %v420_v48 }
 0x1b1   : > { %v470_v50 = vpop.f32.mrf.mxu2 }
 0x1b2   : > { %v471_v51 = vadd.f32 %v613_v49, %v470_v50 }
 0x1b4   : > { %495 = vst.msk [vmem:[%s258_s29] sm:$0xff] %vm494_vm2, %v471_v51 }
 0x1b9   : > { %v473_v52 = vpop.f32.mrf.mxu3 }
 0x1ba   : > { %v474_v53 = vadd.f32 %v613_v49, %v473_v52 }
 0x1bc   : > { %496 = vst.msk [vmem:[%s258_s29 + $0x8] sm:$0xff] %vm494_vm2, %v474_v53 }
 0x1c1   : > { %v476_v54 = vpop.f32.mrf.mxu3 }
 0x1c2   : > { %v477_v55 = vadd.f32 %v613_v49, %v476_v54 }
 0x1c4   : > { %497 = vst.msk [vmem:[%s258_s29 + $0x10] sm:$0xff] %vm494_vm2, %v477_v55 }
 0x1c9   : > { %v479_v56 = vpop.f32.mrf.mxu3 }
 0x1ca   : > { %v480_v57 = vadd.f32 %v613_v49, %v479_v56 }
 0x1cc   : > { %498 = vst.msk [vmem:[%s258_s29 + $0x18] sm:$0xff] %vm494_vm2, %v480_v57 }
 0x1d1   : > { %v482_v58 = vpop.f32.mrf.mxu3 }
 0x1d2   : > { %v483_v59 = vadd.f32 %v613_v49, %v482_v58 }
 0x1d4   : > { %499 = vst.msk [vmem:[%s258_s29 + $0x20] sm:$0xff] %vm494_vm2, %v483_v59 }
 0x1d9   : > { %v485_v60 = vpop.f32.mrf.mxu3 }
 0x1da   : > { %v486_v61 = vadd.f32 %v613_v49, %v485_v60 }
 0x1dc   : > { %500 = vst.msk [vmem:[%s258_s29 + $0x28] sm:$0xff] %vm494_vm2, %v486_v61 }
 0x1e1   : > { %v488_v62 = vpop.f32.mrf.mxu3 }
 0x1e2   : > { %v489_v63 = vadd.f32 %v613_v49, %v488_v62 }
 0x1e4   : > { %501 = vst.msk [vmem:[%s258_s29 + $0x30] sm:$0xff] %vm494_vm2, %v489_v63 }
 0x1e9   : > { %v491_v0 = vpop.f32.mrf.mxu3 }
 0x1ea   : > { %v492_v1 = vadd.f32 %v613_v49, %v491_v0 }
 0x1ec   : > { %502 = vst.msk [vmem:[%s258_s29 + $0x38] sm:$0xff] %vm494_vm2, %v492_v1 }
 0x1ed PF: > { %s16_s21 = sadd.s32 1, %s620_s21  }
 0x1ee   : > { %p13_p4 = scmp.ge.s32.totalorder %s16_s21, 4  }
 0x1f0   :  { %15 = sbr.rel (!%p13_p4) target bundleno = 1 (0x1), region = 74 }

</bundles_post_ra>
